<compile_context>
chip_gen: v6e
topology: v6e:2x2x1
jax: 0.10.0
libtpu: 0.0.40
codegen_flags: <defaults>
</compile_context>

<pallas_src>
import jax
import jax.numpy as jnp
from jax.experimental import pallas as pl
from jax.experimental.pallas import tpu as pltpu


def _make_kernel(block_b, N, D):
    D3 = 3 * D
    inv_sqrt_d = 1.0 / (float(D) ** 0.5)
    inv_n = 1.0 / float(N)

    def kernel(x_ref, wqkv_ref, bqkv_ref, gexp_ref, out_ref):
        # ---- fused QKV projection: one tall matmul on the MXU --------------
        # x_ref: (block_b*N, D)  ->  y2d: (block_b*N, 3D) accumulated in f32.
        y2d = jnp.dot(x_ref[...], wqkv_ref[...],
                      preferred_element_type=jnp.float32)
        y2d = y2d + bqkv_ref[...]                       # bias in f32
        y = y2d.reshape(block_b, N, D3)                 # split batch / seq

        q_rows = y[..., :D]                             # (Bb, N, D)
        k = y[..., D:2 * D]                             # (Bb, N, D)
        v = y[..., 2 * D:]                              # (Bb, N, D)

        # q = Linear(mean_n(x)) == mean_n(Linear(x)) by linearity.
        q = jnp.sum(q_rows, axis=1) * inv_n             # (Bb, D)

        # ---- attention scores / softmax on the VPU+XLU ----------------------
        scores = jnp.sum(k * q[:, None, :], axis=-1) * inv_sqrt_d   # (Bb, N)
        scores = scores - jnp.max(scores, axis=-1, keepdims=True)   # stable
        e = jnp.exp(scores)
        attn = e / jnp.sum(e, axis=-1, keepdims=True)                # (Bb, N)

        # initial_weights = mean_n(attn * V)
        init_w = jnp.sum(attn[:, :, None] * v, axis=1) * inv_n       # (Bb, D)

        # ---- GaussianBasis as a lane-dense expansion matmul -----------------
        # gexp[i, i*2D + j] = gm_packed[i, j]  (zeros elsewhere), so
        # out_flat[b, i*2D + j] = init_w[b, i] * gm_packed[i, j].
        out_ref[...] = jnp.dot(init_w, gexp_ref[...],
                               preferred_element_type=jnp.float32)   # (Bb, 2*D*D)

    return kernel


def gaussian_basis(x, wq, wk, wv, bq, bk, bv, mean1, std1, mean2, std2,
                   block_b=None, matmul_dtype=jnp.float32):
    B, N, D = x.shape

    # ---- host-side (trace-time) preprocessing --------------------------------
    # Fused, pre-transposed projection weights & biases (computed once).
    w_qkv = jnp.concatenate([wq, wk, wv], axis=0).T.astype(matmul_dtype)  # (D, 3D)
    b_qkv = jnp.concatenate([bq, bk, bv]).reshape(1, 3 * D).astype(jnp.float32)

    # Batch-invariant Gaussian matrices, packed lane-wise once.
    idx = jnp.arange(D, dtype=jnp.float32)
    diff = idx[:, None] - idx[None, :]
    gm1 = jnp.exp(-(diff - mean1[:, None]) ** 2 / (2.0 * std1[:, None] ** 2))
    gm2 = jnp.exp(-(diff - mean2[:, None]) ** 2 / (2.0 * std2[:, None] ** 2))
    gm_packed = jnp.concatenate([gm1, gm2], axis=1).astype(jnp.float32)   # (D, 2D)

    # Block-sparse expansion matrix: g_expand[i, i*2D + j] = gm_packed[i, j].
    # The final broadcast-multiply becomes (Bb, D) @ (D, 2*D*D) -> lane-dense.
    g_expand = (jnp.eye(D, dtype=jnp.float32)[:, :, None]
                * gm_packed[None, :, :]).reshape(D, 2 * D * D)            # (D, 2*D*D)

    # ---- batch blocking -------------------------------------------------------
    if block_b is None:
        # One fat batch block per grid step (no artificial ">=2 steps" rule:
        # v5e/v6e are single-TC, the grid is a sequential loop there).  Cap at
        # 128 so the double-buffered working set stays a few MiB, comfortably
        # inside even v7x's 64 MiB VMEM.
        block_b = min(B, 128)
    block_b = max(1, min(block_b, B))
    n_steps = pl.cdiv(B, block_b)
    if n_steps > 1 and block_b % 8 != 0:
        block_b = ((block_b + 7) // 8) * 8   # keep second-minor out dim 8-aligned
        n_steps = pl.cdiv(B, block_b)
    Bp = n_steps * block_b
    if Bp != B:
        # Padded rows see bias-only inputs (finite softmax), sliced off below.
        x = jnp.pad(x, ((0, Bp - B), (0, 0), (0, 0)))

    # Flatten batch & sequence so the kernel's QKV projection is one tall 2-D
    # matmul (no per-batch mini-matmuls).
    x_flat = x.reshape(Bp * N, D).astype(matmul_dtype)

    kernel = _make_kernel(block_b, N, D)

    out_flat = pl.pallas_call(
        kernel,
        out_shape=jax.ShapeDtypeStruct((Bp, 2 * D * D), jnp.float32),
        grid_spec=pl.GridSpec(
            grid=(n_steps,),
            in_specs=[
                pl.BlockSpec((block_b * N, D), lambda b: (b, 0)),
                pl.BlockSpec((D, 3 * D), lambda b: (0, 0)),
                pl.BlockSpec((1, 3 * D), lambda b: (0, 0)),
                pl.BlockSpec((D, 2 * D * D), lambda b: (0, 0)),
            ],
            out_specs=pl.BlockSpec((block_b, 2 * D * D), lambda b: (b, 0)),
        ),
        compiler_params=pltpu.CompilerParams(
            dimension_semantics=("parallel",)),
    )(x_flat, w_qkv, b_qkv, g_expand)

    out = out_flat[:B].reshape(B, D, 2 * D)
    return out[:, :, :D], out[:, :, D:]


def reference(x, wq, wk, wv, bq, bk, bv, mean1, std1, mean2, std2):
    """Pure-JAX reference matching the PyTorch forward semantics."""
    B, N, D = x.shape
    xm = x.mean(axis=1)                                    # (B, D)
    q = xm @ wq.T + bq                                     # (B, D)
    k = x @ wk.T + bk                                      # (B, N, D)
    v = x @ wv.T + bv                                      # (B, N, D)
    scores = jnp.einsum('bd,bnd->bn', q, k) / jnp.sqrt(jnp.float32(D))
    attn = jax.nn.softmax(scores, axis=-1)[..., None]      # (B, N, 1)
    init_w = (attn * v).mean(axis=1)                       # (B, D)
    idx = jnp.arange(D, dtype=jnp.float32)
    diff = idx[:, None] - idx[None, :]
    gm1 = jnp.exp(-(diff - mean1[:, None]) ** 2 / (2.0 * std1[:, None] ** 2))
    gm2 = jnp.exp(-(diff - mean2[:, None]) ** 2 / (2.0 * std2[:, None] ** 2))
    o1 = init_w[:, :, None] * gm1[None]
    o2 = init_w[:, :, None] * gm2[None]
    return o1, o2


if __name__ == "__main__":
    B, N, D = 2, 8, 32

    key = jax.random.PRNGKey(0)
    kx, kq, kk, kv, kbq, kbk, kbv, km1, ks1, km2, ks2 = jax.random.split(key, 11)

    x = jax.random.normal(kx, (B, N, D), dtype=jnp.float32)

    # Deterministic synthetic parameters (shapes per the module's __init__).
    scale = 1.0 / jnp.sqrt(jnp.float32(D))
    wq = jax.random.uniform(kq, (D, D), jnp.float32, -scale, scale)
    wk = jax.random.uniform(kk, (D, D), jnp.float32, -scale, scale)
    wv = jax.random.uniform(kv, (D, D), jnp.float32, -scale, scale)
    bq = jax.random.uniform(kbq, (D,), jnp.float32, -scale, scale)
    bk = jax.random.uniform(kbk, (D,), jnp.float32, -scale, scale)
    bv = jax.random.uniform(kbv, (D,), jnp.float32, -scale, scale)
    # __init__ uses zeros / ones; perturb deterministically so gm1 != gm2.
    mean1 = 0.0 + 0.5 * jax.random.normal(km1, (D,), jnp.float32)
    std1 = 1.0 + 0.2 * jax.random.uniform(ks1, (D,), jnp.float32)
    mean2 = 0.0 + 0.5 * jax.random.normal(km2, (D,), jnp.float32)
    std2 = 1.0 + 0.2 * jax.random.uniform(ks2, (D,), jnp.float32)

    params = (wq, wk, wv, bq, bk, bv, mean1, std1, mean2, std2)

    ref1, ref2 = reference(x, *params)

    # Default: f32 matmul inputs -> must match the f32 reference tightly.
    out1, out2 = gaussian_basis(x, *params)
    jax.block_until_ready((out1, out2))
    assert out1.shape == (B, D, D) and out2.shape == (B, D, D)
    assert jnp.allclose(out1, ref1, atol=1e-5, rtol=1e-5)
    assert jnp.allclose(out2, ref2, atol=1e-5, rtol=1e-5)

    # bf16 matmul-input path (v5e/v6e/v7x MXU-native); f32 accumulation and
    # f32 post-matmul math keep the error to bf16 input rounding only.
    b1, b2 = gaussian_basis(x, *params, matmul_dtype=jnp.bfloat16)
    jax.block_until_ready((b1, b2))
    assert jnp.allclose(b1, ref1, atol=1e-2, rtol=2e-2)
    assert jnp.allclose(b2, ref2, atol=1e-2, rtol=2e-2)

    print("KERNEL_OK")
</pallas_src>

<mosaic_0001>
module attributes {stable_mosaic.version = 11 : i64} {
  func.func @kernel(%arg0: i32, %arg1: memref<16x32xf32, #tpu.memory_space<vmem>>, %arg2: memref<32x96xf32, #tpu.memory_space<vmem>>, %arg3: memref<1x96xf32, #tpu.memory_space<vmem>>, %arg4: memref<32x2048xf32, #tpu.memory_space<vmem>>, %arg5: memref<2x2048xf32, #tpu.memory_space<vmem>>) attributes {dimension_semantics = [#tpu.dimension_semantics<parallel>], iteration_bounds = array<i64: 1>, scalar_prefetch = 0 : i64, scratch_operands = 0 : i64, tpu.core_type = #tpu.core_type<tc>, window_params = [{transform_indices = @transform_0, window_bounds = array<i64: 16, 32>}, {pipeline_mode = #tpu.pipeline_mode<synchronous>, transform_indices = @transform_1, window_bounds = array<i64: 32, 96>}, {pipeline_mode = #tpu.pipeline_mode<synchronous>, transform_indices = @transform_2, window_bounds = array<i64: 1, 96>}, {pipeline_mode = #tpu.pipeline_mode<synchronous>, transform_indices = @transform_3, window_bounds = array<i64: 32, 2048>}, {transform_indices = @transform_4, window_bounds = array<i64: 2, 2048>}]} {
    %c0 = arith.constant 0 : index
    %c0_0 = arith.constant 0 : index
    %0 = vector.load %arg1[%c0, %c0_0] : memref<16x32xf32, #tpu.memory_space<vmem>>, vector<16x32xf32>
    %c0_1 = arith.constant 0 : index
    %c0_2 = arith.constant 0 : index
    %1 = vector.load %arg2[%c0_1, %c0_2] : memref<32x96xf32, #tpu.memory_space<vmem>>, vector<32x96xf32>
    %cst = arith.constant dense<0.000000e+00> : vector<16x96xf32>
    %2 = tpu.matmul %0, %1, %cst {dimension_numbers = #tpu.dot_dimension_numbers<[1], [0], [0], [1], [0, 0, 1, 1], [], []>} : vector<16x32xf32>, vector<32x96xf32>, vector<16x96xf32> -> vector<16x96xf32>
    %c0_3 = arith.constant 0 : index
    %c0_4 = arith.constant 0 : index
    %3 = vector.load %arg3[%c0_3, %c0_4] : memref<1x96xf32, #tpu.memory_space<vmem>>, vector<1x96xf32>
    %4 = vector.broadcast %3 : vector<1x96xf32> to vector<16x96xf32>
    %5 = arith.addf %2, %4 : vector<16x96xf32>
    %6 = vector.shape_cast %5 : vector<16x96xf32> to vector<2x8x96xf32>
    %7 = vector.extract_strided_slice %6 {offsets = [0, 0, 0], sizes = [2, 8, 32], strides = [1, 1, 1]} : vector<2x8x96xf32> to vector<2x8x32xf32>
    %8 = vector.extract_strided_slice %6 {offsets = [0, 0, 32], sizes = [2, 8, 32], strides = [1, 1, 1]} : vector<2x8x96xf32> to vector<2x8x32xf32>
    %9 = vector.extract_strided_slice %6 {offsets = [0, 0, 64], sizes = [2, 8, 32], strides = [1, 1, 1]} : vector<2x8x96xf32> to vector<2x8x32xf32>
    %cst_5 = arith.constant dense<0.000000e+00> : vector<2x32xf32>
    %10 = vector.multi_reduction <add>, %7, %cst_5 [1] : vector<2x8x32xf32> to vector<2x32xf32>
    %cst_6 = arith.constant 1.250000e-01 : f32
    %11 = vector.broadcast %cst_6 : f32 to vector<2x32xf32>
    %12 = arith.mulf %10, %11 : vector<2x32xf32>
    %13 = vector.shape_cast %12 : vector<2x32xf32> to vector<2x1x32xf32>
    %14 = vector.broadcast %13 : vector<2x1x32xf32> to vector<2x8x32xf32>
    %15 = arith.mulf %8, %14 : vector<2x8x32xf32>
    %cst_7 = arith.constant dense<0.000000e+00> : vector<2x8xf32>
    %16 = vector.multi_reduction <add>, %15, %cst_7 [2] : vector<2x8x32xf32> to vector<2x8xf32>
    %cst_8 = arith.constant 0.176776692 : f32
    %17 = vector.broadcast %cst_8 : f32 to vector<2x8xf32>
    %18 = arith.mulf %16, %17 : vector<2x8xf32>
    %cst_9 = arith.constant dense<0xFF800000> : vector<2xf32>
    %19 = vector.multi_reduction <maximumf>, %18, %cst_9 [1] : vector<2x8xf32> to vector<2xf32>
    %20 = vector.shape_cast %19 : vector<2xf32> to vector<2x1xf32>
    %21 = vector.broadcast %20 : vector<2x1xf32> to vector<2x8xf32>
    %22 = arith.subf %18, %21 : vector<2x8xf32>
    %23 = math.exp %22 : vector<2x8xf32>
    %cst_10 = arith.constant dense<0.000000e+00> : vector<2xf32>
    %24 = vector.multi_reduction <add>, %23, %cst_10 [1] : vector<2x8xf32> to vector<2xf32>
    %25 = vector.shape_cast %24 : vector<2xf32> to vector<2x1xf32>
    %26 = vector.broadcast %25 : vector<2x1xf32> to vector<2x8xf32>
    %27 = arith.divf %23, %26 : vector<2x8xf32>
    %28 = vector.shape_cast %27 : vector<2x8xf32> to vector<2x8x1xf32>
    %29 = vector.broadcast %28 : vector<2x8x1xf32> to vector<2x8x32xf32>
    %30 = arith.mulf %29, %9 : vector<2x8x32xf32>
    %cst_11 = arith.constant dense<0.000000e+00> : vector<2x32xf32>
    %31 = vector.multi_reduction <add>, %30, %cst_11 [1] : vector<2x8x32xf32> to vector<2x32xf32>
    %cst_12 = arith.constant 1.250000e-01 : f32
    %32 = vector.broadcast %cst_12 : f32 to vector<2x32xf32>
    %33 = arith.mulf %31, %32 : vector<2x32xf32>
    %c0_13 = arith.constant 0 : index
    %c0_14 = arith.constant 0 : index
    %34 = vector.load %arg4[%c0_13, %c0_14] : memref<32x2048xf32, #tpu.memory_space<vmem>>, vector<32x2048xf32>
    %cst_15 = arith.constant dense<0.000000e+00> : vector<2x2048xf32>
    %35 = tpu.matmul %33, %34, %cst_15 {dimension_numbers = #tpu.dot_dimension_numbers<[1], [0], [0], [1], [0, 0, 1, 1], [], []>} : vector<2x32xf32>, vector<32x2048xf32>, vector<2x2048xf32> -> vector<2x2048xf32>
    %c0_16 = arith.constant 0 : index
    %c0_17 = arith.constant 0 : index
    %36 = vector.load %arg5[%c0_16, %c0_17] : memref<2x2048xf32, #tpu.memory_space<vmem>>, vector<2x2048xf32>
    tpu.vector_store %arg5[%c0_16, %c0_17], %35 {strides = array<i32>} : memref<2x2048xf32, #tpu.memory_space<vmem>>, vector<2x2048xf32>,
    return
  }
  func.func @transform_0(%arg0: i32) -> (i32, i32) {
    %c0_i32 = arith.constant 0 : i32
    %c0_i32_0 = arith.constant 0 : i32
    return %arg0, %c0_i32 : i32, i32
  }
  func.func @transform_1(%arg0: i32) -> (i32, i32) {
    %c0_i32 = arith.constant 0 : i32
    %c0_i32_0 = arith.constant 0 : i32
    %c0_i32_1 = arith.constant 0 : i32
    return %c0_i32, %c0_i32_0 : i32, i32
  }
  func.func @transform_2(%arg0: i32) -> (i32, i32) {
    %c0_i32 = arith.constant 0 : i32
    %c0_i32_0 = arith.constant 0 : i32
    %c0_i32_1 = arith.constant 0 : i32
    return %c0_i32, %c0_i32_0 : i32, i32
  }
  func.func @transform_3(%arg0: i32) -> (i32, i32) {
    %c0_i32 = arith.constant 0 : i32
    %c0_i32_0 = arith.constant 0 : i32
    %c0_i32_1 = arith.constant 0 : i32
    return %c0_i32, %c0_i32_0 : i32, i32
  }
  func.func @transform_4(%arg0: i32) -> (i32, i32) {
    %c0_i32 = arith.constant 0 : i32
    %c0_i32_0 = arith.constant 0 : i32
    return %arg0, %c0_i32 : i32, i32
  }
}

</mosaic_0001>

<bundles_post_ra>
// kernel: tpu_custom_call.1
= control target key start
LH: loop header
LB: loop body
LE: loop exit
PB: predicated region body
PF: predicated region fallthrough
CT: control target
= control target key end

     0   :  { %9 = vsyncpa [#allocation3], 0  ;;  %s1287_s0 = inlined_call_operand.hbm [shape: f32[16,32], index: 0, kind: input, shape index: {}]   ;;  %s1288_s1 = inlined_call_operand.hbm [shape: f32[32,96], index: 1, kind: input, shape index: {}]   ;;  %s1289_s2 = inlined_call_operand.vmem [shape: f32[1,96], index: 2, kind: input, shape index: {}]   ;;  %s1290_s3 = inlined_call_operand.hbm [shape: f32[32,2048], index: 3, kind: input, shape index: {}]   ;;  %s1291_s4 = inlined_call_operand.hbm [shape: f32[2,2048], index: 4, kind: output, shape index: {}]  }
   0x1   :  { %10 = vsyncpa [#allocation6], 0 }
   0x2   :  { %11 = vsyncpa [#allocation4], 0  ;;  %s1181_s15 = smov [#allocation5]   ;;  %s1182_s17 = smov [#allocation2]  }
   0x3   :  { %s29_s16 = sshll.u32 %s1181_s15, 4  ;;  %s17_s18 = sshll.u32 %s1182_s17, 4  ;;  %s30_s16 = int_to_ptr.vmem [resolvable:$true] %s29_s16  ;;  %s18_s18 = int_to_ptr.vmem [resolvable:$true] %s17_s18 }
   0x4   :  { %s1103_s19 = scalar_lea.vmem %s30_s16, 512  ;;  %p1108_p1 = scmp.lt.s32.totalorder %s30_s16, %s30_s16 }
   0x5   :  { %p1104_p0 = scmp.ne.s32.totalorder %s30_s16, %s1103_s19  ;;  %p1109_p2 = scmp.lt.s32.totalorder %s1103_s19, %s1103_s19 }
   0x7   :  { %p1110_p3 = por %p1109_p2, %p1108_p1 }
   0x9   :  { %p1111_p4 = pnand %p1110_p3, %p1104_p0 }
   0xb   :  { %1114 = shalt.err (!%p1111_p4)
}
   0xc   :  { %s1183_s20 = smov 128   ;;  %s1184_s21 = smov 8  }
   0xd   :  { %35 = dma.hbm_to_vmem [thread:$0]  %s1288_s1, 512, %s30_s16, [#allocation6], %s1183_s20, %s1183_s20, %s1184_s21  }
   0xe   :  { %s1123_s24 = scalar_lea.vmem %s18_s18, 256  ;;  %p1128_p6 = scmp.lt.s32.totalorder %s18_s18, %s18_s18 }
   0xf   :  { %p1124_p5 = scmp.ne.s32.totalorder %s18_s18, %s1123_s24  ;;  %p1129_p7 = scmp.lt.s32.totalorder %s1123_s24, %s1123_s24 }
  0x11   :  { %p1130_p8 = por %p1129_p7, %p1128_p6 }
  0x13   :  { %p1131_p9 = pnand %p1130_p8, %p1124_p5 }
  0x15   :  { %1134 = shalt.err (!%p1131_p9)
}
  0x16   :  { %23 = dma.hbm_to_vmem [thread:$0]  %s1287_s0, 256, %s18_s18, [#allocation3], %s1183_s20, %s1183_s20, %s1184_s21  }
  0x17   :  { %s1185_s27 = smov [#allocation7]  }
  0x18   :  { %s43_s28 = sshll.u32 %s1185_s27, 4  ;;  %s44_s28 = int_to_ptr.vmem [resolvable:$true] %s43_s28 }
  0x19   :  { %s1143_s29 = scalar_lea.vmem %s44_s28, 8192  ;;  %p1148_p11 = scmp.lt.s32.totalorder %s44_s28, %s44_s28 }
  0x1a   :  { %p1144_p10 = scmp.ne.s32.totalorder %s44_s28, %s1143_s29  ;;  %p1149_p12 = scmp.lt.s32.totalorder %s1143_s29, %s1143_s29 }
  0x1c   :  { %p1150_p13 = por %p1149_p12, %p1148_p11 }
  0x1e   :  { %p1151_p0 = pnand %p1150_p13, %p1144_p10 }
  0x20   :  { %1154 = shalt.err (!%p1151_p0)
}
  0x21   :  { %s1186_s1 = smov 2048  }
  0x22   :  { %49 = dma.hbm_to_vmem [thread:$0]  %s1290_s3, 8192, %s44_s28, [#allocation6], %s1186_s1, %s1186_s1, %s1183_s20  }
  0x23   :  { %1175 = dma.done.wait [#allocation3], 256  }
  0x24   :  { %1176 = vsyncadd [#allocation3], 4294967040 }
  0x25   :  { %1177 = dma.done.wait [#allocation6], 8704  }
  0x26   :  { %1178 = vsyncadd [#allocation6], 4294958592  ;;  %vm72_vm0 = vcmask 261120   ;;  %v64_v0 = vld [vmem:[#allocation5 + $0x18] sm:$0xff]  ;;  %v63_v1 = vld [vmem:[#allocation5 + $0x10] sm:$0xff]  ;;  %s1188_s6 = smov 96   ;;  %v198_v35 = vlaneseq }
  0x27   :  { %1061 = vmatprep.subr.mxu0 %v64_v0  ;;  %v59_v2 = vld [vmem:[#allocation2] sm:$0xff]  ;;  %v62_v3 = vld [vmem:[#allocation5 + $0x8] sm:$0xff]  ;;  %v61_v4 = vld [vmem:[#allocation5] sm:$0xff]  ;;  %vm208_vm1 = vcmask 1041409   ;;  %vm211_vm2 = vcmask 58368   ;;  %v1189_v47 = vmov 0  }
  0x28   :  { %1062 = vmatpush3.msra.mxu0 %v64_v0  ;;  %1069 = vmatprep.mubr.msk.f32.mxu0 %vm72_vm0, %v59_v2  ;;  %v60_v5 = vld [vmem:[#allocation2 + $0x8] sm:$0xff]  ;;  %v1044_v6 = vld [vmem:[%s1289_s2] ss:$0 sm:$0xff]  ;;  %s1187_s2 = smov 32   ;;  %v199_v36 = vand.u32 127, %v198_v35  ;;  %v1245_v37 = vshrl.u32 %v198_v35, 7 }
  0x29   :  { %1063 = vmatprep.subr.mxu0 %v63_v1  ;;  %1086 = vset.pattern.permute.xlu1 %v1189_v47  ;;  %vm280_vm3 = vcmask 785920   ;;  %s1191_s7 = smov 64   ;;  %s1193_s8 = smov [#allocation8]  }
  0x2a   :  { %1064 = vmatpush3.msra.mxu0 %v63_v1  ;;  %v202_v39 = vsub.s32 %v199_v36, %v1245_v37  ;;  %1085 = vset.pattern.permute.xlu0 %v1189_v47  ;;  %v218_v48 = vsub.s32 0, %v1245_v37  ;;  %v222_v49 = vsub.s32 1, %v1245_v37  ;;  %s1034_s9 = sshll.u32 %s1193_s8, 4  ;;  %s1035_s9 = int_to_ptr.vmem [resolvable:$true] %s1034_s9 }
  0x2b   :  { %1065 = vmatprep.subr.mxu0 %v62_v3  ;;  %s1155_s10 = scalar_lea.vmem %s1035_s9, 512  ;;  %p1160_p2 = scmp.lt.s32.totalorder %s1035_s9, %s1035_s9 }
  0x2c   :  { %1066 = vmatpush3.msra.mxu0 %v62_v3  ;;  %p1156_p1 = scmp.ne.s32.totalorder %s1035_s9, %s1155_s10  ;;  %p1161_p3 = scmp.lt.s32.totalorder %s1155_s10, %s1155_s10 }
  0x2d   :  { %1067 = vmatprep.subr.mxu0 %v61_v4 }
  0x2e   :  { %1068 = vmatpush3.msra.mxu0 %v61_v4  ;;  %p1162_p4 = por %p1161_p3, %p1160_p2 }
  0x2f   :  { %1070 = vmatmul.mubr.msk.f32.vlgmr.msra.gmra.mxu0 %vm72_vm0, %v60_v5 }
  0x30   :  { %p1163_p5 = pnand %p1162_p4, %p1156_p1 }
  0xef   :  { %v1071_v7 = vpop.f32.mrf.mxu0 }
  0xf0   :  { %v1233_v8 = vadd.f32 %v1071_v7, %v1044_v6 }
  0xf1   :  { %v145_v9 = vpop.f32.mrf.mxu0 }
  0xf2   :  { %v161_v10 = vsel %vm72_vm0, %v1233_v8, 0.0  ;;  %v1237_v11 = vadd.f32 %v1044_v6, %v145_v9  ;;  %v346_v9 = vld [vmem:[#allocation7 + $0x188] sm:$0xff] }
  0xf3   :  { %v162_v12 = vrot.slane %v161_v10, 4  ;;  %392 = vmatprep.subr.mxu1 %v346_v9  ;;  %v322_v9 = vld [vmem:[#allocation7 + $0xc8] sm:$0xff] }
  0xf4   :  { %v154_v13 = vsel %vm72_vm0, %v1237_v11, 0.0 }
  0xf5   :  { %v163_v14 = vadd.f32 %v162_v12, %v161_v10  ;;  %v155_v15 = vrot.slane %v154_v13, 4  ;;  %v348_v10 = vld [vmem:[#allocation7 + $0x198] sm:$0xff]  ;;  %v345_v12 = vld [vmem:[#allocation7 + $0x180] sm:$0xff] }
  0xf6   :  { %463 = vmatprep.subr.mxu0 %v348_v10  ;;  %393 = vmatpush1.msra.mxu1 %v345_v12  ;;  %v324_v10 = vld [vmem:[#allocation7 + $0xd8] sm:$0xff]  ;;  %v321_v12 = vld [vmem:[#allocation7 + $0xc0] sm:$0xff] }
  0xf7   :  { %v164_v16 = vrot.slane %v163_v14, 2  ;;  %v156_v17 = vadd.f32 %v155_v15, %v154_v13  ;;  %v347_v13 = vld [vmem:[#allocation7 + $0x190] sm:$0xff]  ;;  %v332_v15 = vld [vmem:[#allocation7 + $0x118] sm:$0xff] }
  0xf8   :  { %464 = vmatpush1.msra.mxu0 %v347_v13  ;;  %v323_v13 = vld [vmem:[#allocation7 + $0xd0] sm:$0xff] }
  0xf9   :  { %v157_v18 = vrot.slane %v156_v17, 2  ;;  %v165_v19 = vadd.f32 %v164_v16, %v163_v14  ;;  %v330_v14 = vld [vmem:[#allocation7 + $0x108] sm:$0xff]  ;;  %v329_v16 = vld [vmem:[#allocation7 + $0x100] sm:$0xff]  ;;  %465 = vmatprep.subr.mxu0 %v332_v15  ;;  %v308_v15 = vld [vmem:[#allocation7 + $0x58] sm:$0xff] }
  0xfa   :  { %394 = vmatprep.subr.mxu1 %v330_v14  ;;  %v306_v14 = vld [vmem:[#allocation7 + $0x48] sm:$0xff] }
  0xfb   :  { %v158_v20 = vadd.f32 %v157_v18, %v156_v17  ;;  %v166_v22 = vrot.slane %v165_v19, 1  ;;  %v331_v17 = vld [vmem:[#allocation7 + $0x110] sm:$0xff]  ;;  %v314_v18 = vld [vmem:[#allocation7 + $0x88] sm:$0xff]  ;;  %395 = vmatpush1.msra.mxu1 %v329_v16  ;;  %v305_v16 = vld [vmem:[#allocation7 + $0x40] sm:$0xff] }
  0xfc   :  { %466 = vmatpush1.msra.mxu0 %v331_v17  ;;  %396 = vmatprep.subr.mxu1 %v314_v18  ;;  %v307_v17 = vld [vmem:[#allocation7 + $0x50] sm:$0xff]  ;;  %v358_v18 = vld [vmem:[#allocation7 + $0x1e8] sm:$0xff] }
  0xfd   :  { %v159_v21 = vrot.slane %v158_v20, 1  ;;  %v167_v25 = vadd.f32 %v166_v22, %v165_v19  ;;  %v316_v19 = vld [vmem:[#allocation7 + $0x98] sm:$0xff]  ;;  %v298_v22 = vld [vmem:[#allocation7 + $0x8] sm:$0xff] }
  0xfe   :  { %467 = vmatprep.subr.mxu0 %v316_v19  ;;  %v360_v19 = vld [vmem:[#allocation7 + $0x1f8] sm:$0xff] }
  0xff   :  { %v160_v23 = vadd.f32 %v159_v21, %v158_v20  ;;  %v169_v26 = vmul.f32 0.125, %v167_v25  ;;  %v313_v20 = vld [vmem:[#allocation7 + $0x80] sm:$0xff]  ;;  %v315_v21 = vld [vmem:[#allocation7 + $0x90] sm:$0xff] }
 0x100   :  { %v299_v25 = vld [vmem:[#allocation7 + $0x10] sm:$0xff]  ;;  %397 = vmatpush1.msra.mxu1 %v313_v20  ;;  %468 = vmatpush1.msra.mxu0 %v315_v21  ;;  %v357_v20 = vld [vmem:[#allocation7 + $0x1e0] sm:$0xff] }
 0x101   :  { %v168_v24 = vmul.f32 0.125, %v160_v23  ;;  %v300_v23 = vld [vmem:[#allocation7 + $0x18] sm:$0xff]  ;;  %398 = vmatprep.subr.mxu1 %v298_v22  ;;  %v359_v21 = vld [vmem:[#allocation7 + $0x1f0] sm:$0xff]  ;;  %v342_v22 = vld [vmem:[#allocation7 + $0x168] sm:$0xff] }
 0x102   :  { %469 = vmatprep.subr.mxu0 %v300_v23  ;;  %v344_v23 = vld [vmem:[#allocation7 + $0x178] sm:$0xff] }
 0x103   :  { %172 = vrot.lane.b32.xlu0 %v168_v24, %s1187_s2  ;;  %v297_v24 = vld [vmem:[#allocation7] sm:$0xff]  ;;  %470 = vmatpush1.msra.mxu0 %v299_v25  ;;  %v343_v25 = vld [vmem:[#allocation7 + $0x170] sm:$0xff] }
 0x104   :  { %399 = vmatpush1.msra.mxu1 %v297_v24  ;;  %v341_v24 = vld [vmem:[#allocation7 + $0x160] sm:$0xff] }
 0x107   :  { %174 = vrot.lane.b32.xlu0 %v169_v26, %s1187_s2  ;;  %v350_v26 = vld [vmem:[#allocation7 + $0x1a8] sm:$0xff] }
 0x108   :  { %534 = vmatprep.subr.mxu1 %v350_v26  ;;  %v326_v26 = vld [vmem:[#allocation7 + $0xe8] sm:$0xff] }
 0x175   :  { %v173_v27 = vpop.permute.xlu0 %172 }
 0x176   :  { %v178_v28 = vmul.f32 %v173_v27, %v1237_v11  ;;  %v352_v27 = vld [vmem:[#allocation7 + $0x1b8] sm:$0xff] }
 0x177   :  { %605 = vmatprep.subr.mxu0 %v352_v27  ;;  %v328_v27 = vld [vmem:[#allocation7 + $0xf8] sm:$0xff] }
 0x178   :  { %182 = vrot.lane.b32.xlu1 %v178_v28, %s1188_s6  ;;  %v1190_v28 = vmov 0.0  }
 0x179   :  { %v175_v29 = vpop.permute.xlu0 %174  ;;  %432 = vmatprep.mubr.f32.mxu1 %v1190_v28  ;;  %503 = vmatprep.mubr.f32.mxu0 %v1190_v28 }
 0x17a   :  { %v179_v30 = vmul.f32 %v175_v29, %v1233_v8 }
 0x17c   :  { %184 = vrot.lane.b32.xlu1 %v179_v30, %s1188_s6 }
 0x1ea   :  { %v183_v31 = vpop.permute.xlu1 %182 }
 0x1eb   :  { %v188_v32 = vsel %vm72_vm0, %v183_v31, 0.0 }
 0x1ec   :  { %189 = vadd.xlane.f32.xlu0 %v188_v32 }
 0x1ee   :  { %v185_v33 = vpop.permute.xlu1 %184 }
 0x1ef   :  { %v191_v34 = vsel %vm72_vm0, %v185_v33, 0.0 }
 0x1f0   :  { %192 = vadd.xlane.f32.xlu1 %v191_v34 }
 0x275   :  { %v190_v38 = vpop.xlane.xlu0 %189 }
 0x276   :  { %v194_v40 = vmul.f32 0.17677669, %v190_v38 }
 0x278   :  { %v203_v43 = vrot.slane %v194_v40, %v202_v39 }
 0x279   :  { %v193_v41 = vpop.xlane.xlu1 %192 }
 0x27a   :  { %v195_v42 = vmul.f32 0.17677669, %v193_v41 }
 0x27c   :  { %v207_v44 = vrot.slane %v195_v42, %v202_v39 }
 0x27e   :  { %v209_v45 = vsel %vm208_vm1, %v207_v44, %v203_v43 }
 0x27f   :  { %v212_v46 = vsel %vm211_vm2, %v209_v45, -inf }
 0x280   :  { %213 = vmax.xlane.f32.xlu0 %v212_v46 }
 0x309   :  { %v214_v50 = vpop.xlane.xlu0 %213 }
 0x30a   :  { %v219_v51 = vrot.slane %v214_v50, %v218_v48  ;;  %v223_v52 = vrot.slane %v214_v50, %v222_v49  ;;  %v349_v50 = vld [vmem:[#allocation7 + $0x1a0] sm:$0xff] }
 0x30c   :  { %v226_v53 = vsub.f32 %v194_v40, %v219_v51  ;;  %v227_v54 = vsub.f32 %v195_v42, %v223_v52  ;;  %v334_v52 = vld [vmem:[#allocation7 + $0x128] sm:$0xff] }
 0x30e   :  { %v228_v55 = vmul.f32 1.442695, %v226_v53  ;;  %v230_v56 = vmul.f32 1.442695, %v227_v54  ;;  %v336_v53 = vld [vmem:[#allocation7 + $0x138] sm:$0xff]  ;;  %v333_v54 = vld [vmem:[#allocation7 + $0x120] sm:$0xff] }
 0x310   :  { %1087 = vpow2.f32 %v228_v55  ;;  %v335_v55 = vld [vmem:[#allocation7 + $0x130] sm:$0xff] }
 0x311   :  { %1089 = vpow2.f32 %v230_v56  ;;  %v318_v56 = vld [vmem:[#allocation7 + $0xa8] sm:$0xff] }
 0x31d   :  { %v1088_v57 = vpop.eup %1087 }
 0x31e   :  { %v1090_v58 = vpop.eup %1089  ;;  %235 = vperm.xlu0 %1085, %v1088_v57  }
 0x31f   :  { %238 = vperm.xlu1 %1086, %v1090_v58  }
 0x399   :  { %v236_v59 = vpop.permute.xlu0 %235 }
 0x39a   :  { %v239_v60 = vpop.permute.xlu1 %238  ;;  %v243_v61 = vrot.slane %v236_v59, %v202_v39  ;;  %v319_v59 = vld [vmem:[#allocation7 + $0xb0] sm:$0xff] }
 0x39b   :  { %v247_v62 = vrot.slane %v239_v60, %v202_v39  ;;  %v302_v60 = vld [vmem:[#allocation7 + $0x28] sm:$0xff] }
 0x39d   :  { %v248_v63 = vsel %vm208_vm1, %v247_v62, %v243_v61  ;;  %v304_v61 = vld [vmem:[#allocation7 + $0x38] sm:$0xff]  ;;  %v301_v62 = vld [vmem:[#allocation7 + $0x20] sm:$0xff] }
 0x39e   :  { %v250_v0 = vsel %vm211_vm2, %v248_v63, 0.0  ;;  %v303_v63 = vld [vmem:[#allocation7 + $0x30] sm:$0xff] }
 0x39f   :  { %251 = vadd.xlane.f32.xlu1 %v250_v0  ;;  %v354_v0 = vld [vmem:[#allocation7 + $0x1c8] sm:$0xff] }
 0x428   :  { %v252_v1 = vpop.xlane.xlu1 %251 }
 0x429   :  { %v257_v2 = vrot.slane %v252_v1, %v218_v48  ;;  %v261_v3 = vrot.slane %v252_v1, %v222_v49  ;;  %v356_v1 = vld [vmem:[#allocation7 + $0x1d8] sm:$0xff] }
 0x42b   :  { %1091 = vrcp.f32 %v257_v2  ;;  %v353_v2 = vld [vmem:[#allocation7 + $0x1c0] sm:$0xff] }
 0x42c   :  { %1093 = vrcp.f32 %v261_v3  ;;  %v355_v3 = vld [vmem:[#allocation7 + $0x1d0] sm:$0xff] }
 0x438   :  { %v1092_v4 = vpop.eup %1091 }
 0x439   :  { %v265_v5 = vmul.f32 %v1092_v4, %v1088_v57  ;;  %v1094_v6 = vpop.eup %1093  ;;  %v320_v57 = vld [vmem:[#allocation7 + $0xb8] sm:$0xff]  ;;  %v338_v4 = vld [vmem:[#allocation7 + $0x148] sm:$0xff] }
 0x43a   :  { %v267_v7 = vmul.f32 %v1094_v6, %v1090_v58  ;;  %v317_v58 = vld [vmem:[#allocation7 + $0xa0] sm:$0xff] }
 0x43b   :  { %270 = vperm.xlu0 %1085, %v265_v5   ;;  %v340_v5 = vld [vmem:[#allocation7 + $0x158] sm:$0xff]  ;;  %v337_v6 = vld [vmem:[#allocation7 + $0x140] sm:$0xff] }
 0x43f   :  { %275 = vperm.xlu0 %1085, %v267_v7   ;;  %v339_v7 = vld [vmem:[#allocation7 + $0x150] sm:$0xff] }
 0x4b6   :  { %v271_v29 = vpop.permute.xlu0 %270 }
 0x4b7   :  { %v278_v30 = vmul.f32 %v271_v29, %v1237_v11  ;;  %v325_v29 = vld [vmem:[#allocation7 + $0xe0] sm:$0xff] }
 0x4b9   :  { %v281_v31 = vsel %vm280_vm3, %v278_v30, 0.0  ;;  %v327_v30 = vld [vmem:[#allocation7 + $0xf0] sm:$0xff] }
 0x4ba   :  { %v282_v32 = vrot.slane %v281_v31, 4  ;;  %v276_v33 = vpop.permute.xlu0 %275 }
 0x4bb   :  { %v279_v34 = vmul.f32 %v276_v33, %v1233_v8  ;;  %v351_v8 = vld [vmem:[#allocation7 + $0x1b0] sm:$0xff]  ;;  %v309_v33 = vld [vmem:[#allocation7 + $0x60] sm:$0xff] }
 0x4bc   :  { %v283_v35 = vadd.f32 %v282_v32, %v281_v31  ;;  %v310_v31 = vld [vmem:[#allocation7 + $0x68] sm:$0xff]  ;;  %v312_v32 = vld [vmem:[#allocation7 + $0x78] sm:$0xff] }
 0x4bd   :  { %v288_v36 = vsel %vm280_vm3, %v279_v34, 0.0  ;;  %v311_v34 = vld [vmem:[#allocation7 + $0x70] sm:$0xff] }
 0x4be   :  { %v284_v38 = vrot.slane %v283_v35, 2  ;;  %v289_v39 = vrot.slane %v288_v36, 4 }
 0x4c0   :  { %v285_v40 = vadd.f32 %v284_v38, %v283_v35  ;;  %v290_v41 = vadd.f32 %v289_v39, %v288_v36  ;;  %v1192_v35 = vmov 1983009808  }
 0x4c1   :  { %v955_v36 = vunpack.c.l.s4 %v1192_v35 }
 0x4c2   :  { %v286_v42 = vrot.slane %v285_v40, 1  ;;  %v291_v43 = vrot.slane %v290_v41, 2 }
 0x4c3   :  { %v956_v38 = vunpack.c.0.s8 %v955_v36 }
 0x4c4   :  { %v292_v44 = vadd.f32 %v291_v43, %v290_v41  ;;  %v287_v46 = vadd.f32 %v286_v42, %v285_v40 }
 0x4c5   :  { %v959_v41 = vsub.s32 %v956_v38, %v1245_v37 }
 0x4c6   :  { %v293_v45 = vrot.slane %v292_v44, 1  ;;  %v295_v48 = vmul.f32 0.125, %v287_v46 }
 0x4c8   :  { %v294_v47 = vadd.f32 %v293_v45, %v292_v44 }
 0x4ca   :  { %v296_v49 = vmul.f32 0.125, %v294_v47 }
 0x4cc   :  { %v363_v11 = vsel %vm208_vm1, %v296_v49, %v295_v48 }
 0x4cd   :  { %364 = vrot.lane.b32.xlu0 %v363_v11, %s1191_s7 }
 0x53f   :  { %v1259_v51 = vpop.permute.xlu0 %364 }
 0x540   :  { %1047 = vmatmul.mubr.msk.f32.vlgmr.msra.gmra.mxu1 %vm72_vm0, %v1259_v51  ;;  %1048 = vmatmul.mubr.msk.f32.vlgmr.msra.gmra.mxu0 %vm72_vm0, %v1259_v51 }
 0x541   :  { %535 = vmatpush1.msra.mxu1 %v349_v50  ;;  %606 = vmatpush1.msra.mxu0 %v351_v8 }
 0x542   :  { %536 = vmatprep.subr.mxu1 %v334_v52  ;;  %607 = vmatprep.subr.mxu0 %v336_v53 }
 0x543   :  { %537 = vmatpush1.msra.mxu1 %v333_v54  ;;  %608 = vmatpush1.msra.mxu0 %v335_v55 }
 0x544   :  { %538 = vmatprep.subr.mxu1 %v318_v56  ;;  %609 = vmatprep.subr.mxu0 %v320_v57 }
 0x545   :  { %539 = vmatpush1.msra.mxu1 %v317_v58  ;;  %610 = vmatpush1.msra.mxu0 %v319_v59 }
 0x546   :  { %540 = vmatprep.subr.mxu1 %v302_v60  ;;  %611 = vmatprep.subr.mxu0 %v304_v61 }
 0x547   :  { %541 = vmatpush1.msra.mxu1 %v301_v62  ;;  %574 = vmatprep.mubr.f32.mxu1 %v1190_v28 }
 0x548   :  { %612 = vmatpush1.msra.mxu0 %v303_v63  ;;  %645 = vmatprep.mubr.f32.mxu0 %v1190_v28 }
 0x549   :  { %1049 = vmatmul.mubr.msk.f32.vlgmr.msra.gmra.mxu1 %vm72_vm0, %v1259_v51  ;;  %1050 = vmatmul.mubr.msk.f32.vlgmr.msra.gmra.mxu0 %vm72_vm0, %v1259_v51 }
 0x54a   :  { %676 = vmatprep.subr.mxu1 %v354_v0  ;;  %747 = vmatprep.subr.mxu0 %v356_v1 }
 0x54b   :  { %677 = vmatpush1.msra.mxu1 %v353_v2  ;;  %748 = vmatpush1.msra.mxu0 %v355_v3 }
 0x54c   :  { %678 = vmatprep.subr.mxu1 %v338_v4  ;;  %749 = vmatprep.subr.mxu0 %v340_v5 }
 0x54d   :  { %679 = vmatpush1.msra.mxu1 %v337_v6  ;;  %750 = vmatpush1.msra.mxu0 %v339_v7 }
 0x54e   :  { %680 = vmatprep.subr.mxu1 %v322_v9  ;;  %751 = vmatprep.subr.mxu0 %v324_v10 }
 0x54f   :  { %681 = vmatpush1.msra.mxu1 %v321_v12  ;;  %752 = vmatpush1.msra.mxu0 %v323_v13 }
 0x550   :  { %682 = vmatprep.subr.mxu1 %v306_v14  ;;  %753 = vmatprep.subr.mxu0 %v308_v15 }
 0x551   :  { %683 = vmatpush1.msra.mxu1 %v305_v16  ;;  %716 = vmatprep.mubr.f32.mxu1 %v1190_v28 }
 0x552   :  { %754 = vmatpush1.msra.mxu0 %v307_v17  ;;  %787 = vmatprep.mubr.f32.mxu0 %v1190_v28 }
 0x553   :  { %1051 = vmatmul.mubr.msk.f32.vlgmr.msra.gmra.mxu1 %vm72_vm0, %v1259_v51  ;;  %1052 = vmatmul.mubr.msk.f32.vlgmr.msra.gmra.mxu0 %vm72_vm0, %v1259_v51 }
 0x554   :  { %818 = vmatprep.subr.mxu1 %v358_v18  ;;  %889 = vmatprep.subr.mxu0 %v360_v19 }
 0x555   :  { %819 = vmatpush1.msra.mxu1 %v357_v20  ;;  %890 = vmatpush1.msra.mxu0 %v359_v21 }
 0x556   :  { %820 = vmatprep.subr.mxu1 %v342_v22  ;;  %891 = vmatprep.subr.mxu0 %v344_v23 }
 0x557   :  { %821 = vmatpush1.msra.mxu1 %v341_v24  ;;  %892 = vmatpush1.msra.mxu0 %v343_v25 }
 0x558   :  { %822 = vmatprep.subr.mxu1 %v326_v26  ;;  %893 = vmatprep.subr.mxu0 %v328_v27 }
 0x559   :  { %823 = vmatpush1.msra.mxu1 %v325_v29  ;;  %894 = vmatpush1.msra.mxu0 %v327_v30 }
 0x55a   :  { %824 = vmatprep.subr.mxu1 %v310_v31  ;;  %895 = vmatprep.subr.mxu0 %v312_v32 }
 0x55b   :  { %825 = vmatpush1.msra.mxu1 %v309_v33  ;;  %858 = vmatprep.mubr.f32.mxu1 %v1190_v28 }
 0x55c   :  { %896 = vmatpush1.msra.mxu0 %v311_v34  ;;  %929 = vmatprep.mubr.f32.mxu0 %v1190_v28 }
 0x55d   :  { %1053 = vmatmul.mubr.msk.f32.vlgmr.msra.gmra.mxu1 %vm72_vm0, %v1259_v51  ;;  %1054 = vmatmul.mubr.msk.f32.vlgmr.msra.gmra.mxu0 %vm72_vm0, %v1259_v51 }
 0x600   :  { %v434_v39 = vpop.f32.mrf.mxu1  ;;  %v505_v40 = vpop.f32.mrf.mxu0 }
 0x602   :  { %v436_v42 = vpop.f32.mrf.mxu1  ;;  %v507_v43 = vpop.f32.mrf.mxu0 }
 0x603   :  { %v952_v44 = vcombine.low %v434_v39, %v436_v42  ;;  %v953_v45 = vcombine.low %v505_v40, %v507_v43 }
 0x605   :  { %v960_v46 = vrot.slane %v952_v44, %v959_v41  ;;  %v967_v47 = vrot.slane %v953_v45, %v959_v41 }
 0x607   :  { %v968_v28 = vcombine.low %v960_v46, %v967_v47 }
 0x609   :  { %1024 = vst [vmem:[#allocation8] sm:$0xff] %v968_v28  ;;  %v576_v48 = vpop.f32.mrf.mxu1  ;;  %v647_v49 = vpop.f32.mrf.mxu0 }
 0x60b   :  { %v578_v11 = vpop.f32.mrf.mxu1  ;;  %v649_v50 = vpop.f32.mrf.mxu0 }
 0x60c   :  { %v969_v8 = vcombine.low %v576_v48, %v578_v11  ;;  %v970_v51 = vcombine.low %v647_v49, %v649_v50 }
 0x60e   :  { %v977_v52 = vrot.slane %v969_v8, %v959_v41  ;;  %v984_v53 = vrot.slane %v970_v51, %v959_v41 }
 0x610   :  { %v985_v54 = vcombine.low %v977_v52, %v984_v53 }
 0x612   :  { %1025 = vst [vmem:[#allocation8 + $0x8] sm:$0xff] %v985_v54 }
 0x613   :  { %v718_v55 = vpop.f32.mrf.mxu1  ;;  %v789_v37 = vpop.f32.mrf.mxu0 }
 0x615   :  { %v720_v56 = vpop.f32.mrf.mxu1  ;;  %v791_v57 = vpop.f32.mrf.mxu0 }
 0x616   :  { %v986_v58 = vcombine.low %v718_v55, %v720_v56  ;;  %v987_v59 = vcombine.low %v789_v37, %v791_v57 }
 0x618   :  { %v994_v60 = vrot.slane %v986_v58, %v959_v41  ;;  %v1001_v61 = vrot.slane %v987_v59, %v959_v41 }
 0x61a   :  { %v1002_v62 = vcombine.low %v994_v60, %v1001_v61 }
 0x61c   :  { %1026 = vst [vmem:[#allocation8 + $0x10] sm:$0xff] %v1002_v62 }
 0x61d   :  { %v860_v63 = vpop.f32.mrf.mxu1  ;;  %v931_v0 = vpop.f32.mrf.mxu0 }
 0x61f   :  { %v862_v1 = vpop.f32.mrf.mxu1  ;;  %v933_v2 = vpop.f32.mrf.mxu0 }
 0x620   :  { %v1003_v3 = vcombine.low %v860_v63, %v862_v1  ;;  %v1004_v4 = vcombine.low %v931_v0, %v933_v2 }
 0x622   :  { %v1011_v5 = vrot.slane %v1003_v3, %v959_v41  ;;  %v1018_v6 = vrot.slane %v1004_v4, %v959_v41 }
 0x624   :  { %v1019_v7 = vcombine.low %v1011_v5, %v1018_v6 }
 0x626   :  { %1027 = vst [vmem:[#allocation8 + $0x18] sm:$0xff] %v1019_v7 }
 0x627   :  { %1166 = shalt.err (!%p1163_p5)
}
 0x628   :  { %1037 = dma.vmem_to_hbm [thread:$0]  %s1035_s9, 512, %s1291_s4, [#allocation4]  }
 0x629   :  { %1179 = dma.done.wait [#allocation4], 512  }
 0x62a   :  { %1180 = vsyncadd [#allocation4], 4294966784 }
 0x62b   :  { %1041 = vsyncpa [#allocation3], 1 }
 0x62c   :  { %1042 = vsyncpa [#allocation6], 1 }
 0x62d   :  { %1043 = vsyncpa [#allocation4], 1 }

</bundles_post_ra>
